<compile_context>
chip_gen: v7x
topology: tpu7x:2x2x1
jax: 0.10.0
libtpu: 0.0.40
codegen_flags: <defaults>
</compile_context>

<pallas_src>
import functools

import jax
import jax.numpy as jnp
from jax.experimental import pallas as pl
from jax.experimental.pallas import tpu as pltpu


LN_EPS = 1e-5
LANE = 128
SUBLANE = 8


def _round_up(n, m):
    return ((n + m - 1) // m) * m


def _cdiv(a, b):
    return -(-a // b)


def _vmem_capacity_bytes():
    """Physical VMEM per TensorCore; conservative 64 MiB default if unknown."""
    try:
        info = pltpu.get_tpu_info()
        cap = getattr(info, "vmem_capacity_bytes", None)
        if cap:
            return int(cap)
    except Exception:
        pass
    return 64 << 20


def _choose_batch_tiling(batch, tb_cap):
    """Pick (TB, grid_n, Bp) with <1 sublane-tile of pad waste and, when
    possible, >=2 grid steps so the 'parallel' axis can use both v7x cores."""
    b8 = _round_up(max(batch, 1), SUBLANE)
    grid_n = _cdiv(b8, tb_cap)
    if b8 > SUBLANE:
        grid_n = max(grid_n, 2)
    tb = _round_up(_cdiv(b8, grid_n), SUBLANE)
    grid_n = _cdiv(b8, tb)
    return tb, grid_n, tb * grid_n


def liquid_cell_kernel(x_ref, h_ref, wih_ref, whh_ref, wtau_ref, rows_ref,
                       out_ref, *, dt, hidden_size, approx_recip):
    # x_ref:   [TB, Ip]  activation dtype (== weight dtype)
    # h_ref:   [TB, Hp]  f32 (kept full precision for the final blend)
    # wih_ref: [Ip, Hp], whh_ref/wtau_ref: [Hp, Hp]  (resident, constant index)
    # rows_ref:[8, Hp] f32 rows: 0=b_ih+b_hh, 1=gamma, 2=beta, 3=b_tau
    h_f32 = h_ref[...]
    w_dtype = whh_ref.dtype

    # Two accumulated MXU matmuls — no [x|h] concat slab needed.
    pre = jnp.dot(x_ref[...], wih_ref[...], preferred_element_type=jnp.float32)
    pre = pre + jnp.dot(h_f32.astype(w_dtype), whh_ref[...],
                        preferred_element_type=jnp.float32)
    pre = pre + rows_ref[0:1, :]                      # pre-summed bias
    # TODO(synk): dropout on x_proj is identity in eval mode; training-mode RNG mask omitted.

    # Masked LayerNorm over the first `hidden_size` lanes (padded lanes of
    # `pre` are exactly zero because weights/biases are zero-padded).
    hp = pre.shape[-1]
    inv_h = 1.0 / float(hidden_size)
    mean = jnp.sum(pre, axis=-1, keepdims=True) * inv_h
    centered = pre - mean
    if hidden_size != hp:
        lane_idx = jax.lax.broadcasted_iota(jnp.int32, (1, hp), 1)
        centered = jnp.where(lane_idx < hidden_size, centered, 0.0)
    var = jnp.sum(centered * centered, axis=-1, keepdims=True) * inv_h
    scale = jax.lax.rsqrt(var + LN_EPS) * rows_ref[1:2, :]   # gamma folded in
    h_target = centered * scale + rows_ref[2:3, :]

    # Adaptive time constant.
    tau_lin = jnp.dot(h_target.astype(wtau_ref.dtype), wtau_ref[...],
                      preferred_element_type=jnp.float32) + rows_ref[3:4, :]
    # tau = 0.2 + 1.8*sigmoid(z); alpha = dt/tau  ==  dt*(1+e)/(2 + 0.2*e),
    # e = exp(-z).  One EUP exp + one EUP reciprocal (vs exp + 2 reciprocals).
    e = jnp.exp(jnp.minimum(-tau_lin, 60.0))   # clamp avoids inf/inf on extreme logits
    alpha = (dt * (1.0 + e)) * pl.reciprocal(2.0 + 0.2 * e, approx=approx_recip)

    out_ref[...] = (h_f32 + alpha * (h_target - h_f32)).astype(out_ref.dtype)


def prepare_params(params, weight_dtype=jnp.bfloat16):
    """One-time weight prep: transpose to [in, out], zero-pad to lane-dense
    shapes, pack the four per-feature vectors into one (8, Hp) slab, optional
    bf16 cast. Reuse the result across timesteps."""
    H, I = params["W_ih"].shape               # PyTorch convention [out, in]
    Ip = _round_up(I, LANE)
    Hp = _round_up(H, LANE)

    def padw(w_t, rows, cols):
        out = jnp.zeros((rows, cols), jnp.float32)
        return out.at[:w_t.shape[0], :w_t.shape[1]].set(w_t.astype(jnp.float32))

    rows = jnp.zeros((SUBLANE, Hp), jnp.float32)
    rows = rows.at[0, :H].set((params["b_ih"] + params["b_hh"]).astype(jnp.float32))
    rows = rows.at[1, :H].set(params["gamma"].astype(jnp.float32))
    rows = rows.at[2, :H].set(params["beta"].astype(jnp.float32))
    rows = rows.at[3, :H].set(params["b_tau"].astype(jnp.float32))

    return {
        "wih_t": padw(params["W_ih"].T, Ip, Hp).astype(weight_dtype),
        "whh_t": padw(params["W_hh"].T, Hp, Hp).astype(weight_dtype),
        "wtau_t": padw(params["W_tau"].T, Hp, Hp).astype(weight_dtype),
        "rows": rows,                          # bias / gamma / beta / b_tau packed
        "input_size": I,
        "hidden_size": H,
        "in_padded": Ip,
        "hid_padded": Hp,
    }


def simple_liquid_cell(x, h_prev, prep, dt=0.1):
    """Liquid-cell forward with a batch-tiled Pallas kernel.

    x:      [B, input_size]  (f32, or already in the weight dtype / pre-padded)
    h_prev: [B, hidden_size] (f32, or pre-padded)
    prep:   output of prepare_params()
    """
    B, I = x.shape
    H = h_prev.shape[1]
    Ip, Hp = prep["in_padded"], prep["hid_padded"]
    w_dtype = jnp.dtype(prep["wih_t"].dtype)
    act_dtype = w_dtype                       # deliver x already in weight dtype
    approx_recip = w_dtype == jnp.dtype(jnp.bfloat16)

    # Generation-aware sizing.
    vmem_cap = _vmem_capacity_bytes()
    tb_cap = 512 if vmem_cap >= (96 << 20) else 256    # v5e/v6e (128 MiB) vs v7x (64 MiB)
    TB, grid_n, Bp = _choose_batch_tiling(B, tb_cap)

    # Lane/sublane padding (zero-copy when the caller already supplies padded
    # arrays in the right dtype, e.g. when feeding the previous step's output).
    if x.shape == (Bp, Ip) and x.dtype == act_dtype:
        x_pad = x
    else:
        x_pad = jnp.zeros((Bp, Ip), act_dtype).at[:B, :I].set(x.astype(act_dtype))
    if h_prev.shape == (Bp, Hp) and h_prev.dtype == jnp.float32:
        h_pad = h_prev
    else:
        h_pad = jnp.zeros((Bp, Hp), jnp.float32).at[:B, :H].set(
            h_prev.astype(jnp.float32))

    # VMEM budget: resident weights (+margin in case they end up 2x-buffered)
    # plus double-buffered activation/output tiles, capped at ~75% of capacity.
    w_bytes = (Ip * Hp + 2 * Hp * Hp) * w_dtype.itemsize + SUBLANE * Hp * 4
    tile_bytes = 2 * (TB * Ip * jnp.dtype(act_dtype).itemsize + 2 * TB * Hp * 4)
    vmem_limit = int(min(max(2 * w_bytes + tile_bytes + (4 << 20), 16 << 20),
                         (vmem_cap * 3) // 4))
    # TODO(synk): if resident weights ever exceed ~60% of VMEM (very large H on
    # v7x), add an N-tiled fallback grid axis instead of assuming full residency.
    # TODO(synk): on v5e, consider pipeline_mode=pl.Buffered(3) on the x/h specs
    # for large batches (lowest HBM BW); depth 2 suffices on v6e/v7x.

    kernel = functools.partial(
        liquid_cell_kernel, dt=float(dt), hidden_size=H,
        approx_recip=bool(approx_recip))

    def run(single_buffer_weights):
        const_kwargs = {}
        if single_buffer_weights:
            const_kwargs["pipeline_mode"] = pl.Buffered(1)

        def const_spec(shape):
            return pl.BlockSpec(shape, lambda i: (0, 0), **const_kwargs)

        call = pl.pallas_call(
            kernel,
            out_shape=jax.ShapeDtypeStruct((Bp, Hp), jnp.float32),
            grid_spec=pltpu.PrefetchScalarGridSpec(
                num_scalar_prefetch=0,
                grid=(grid_n,),
                in_specs=[
                    pl.BlockSpec((TB, Ip), lambda i: (i, 0)),   # x tile (pipelined)
                    pl.BlockSpec((TB, Hp), lambda i: (i, 0)),   # h_prev tile (pipelined, f32)
                    const_spec((Ip, Hp)),                       # W_ih^T (resident)
                    const_spec((Hp, Hp)),                       # W_hh^T (resident)
                    const_spec((Hp, Hp)),                       # W_tau^T (resident)
                    const_spec((SUBLANE, Hp)),                  # bias/gamma/beta/b_tau rows
                ],
                out_specs=pl.BlockSpec((TB, Hp), lambda i: (i, 0)),
            ),
            compiler_params=pltpu.CompilerParams(
                dimension_semantics=("parallel",),
                vmem_limit_bytes=vmem_limit,
            ),
        )
        return call(x_pad, h_pad, prep["wih_t"], prep["whh_t"],
                    prep["wtau_t"], prep["rows"])

    try:
        out = jax.block_until_ready(run(True))
    except Exception:
        # pl.Buffered(1) unsupported on this jax/Mosaic build — fall back to
        # default double-buffering for the constant-index weight blocks.
        out = run(False)

    return out[:B, :H]


def xavier_uniform(key, shape, gain=1.0):
    fan_out, fan_in = shape  # PyTorch Linear weight: [out, in]
    bound = gain * jnp.sqrt(6.0 / (fan_in + fan_out))
    return jax.random.uniform(key, shape, jnp.float32, -bound, bound)


def init_params(key, input_size, hidden_size):
    k1, k2, k3 = jax.random.split(key, 3)
    return {
        "W_ih": xavier_uniform(k1, (hidden_size, input_size)),
        "b_ih": jnp.zeros((hidden_size,), jnp.float32),
        "W_hh": xavier_uniform(k2, (hidden_size, hidden_size)),
        "b_hh": jnp.zeros((hidden_size,), jnp.float32),
        "W_tau": xavier_uniform(k3, (hidden_size, hidden_size), gain=0.01),
        "b_tau": jnp.zeros((hidden_size,), jnp.float32),
        "gamma": jnp.ones((hidden_size,), jnp.float32),
        "beta": jnp.zeros((hidden_size,), jnp.float32),
    }


def reference_forward(x, h_prev, params, dt=0.1):
    x_proj = x @ params["W_ih"].T + params["b_ih"]
    h_proj = h_prev @ params["W_hh"].T + params["b_hh"]
    pre = x_proj + h_proj
    mean = jnp.mean(pre, axis=-1, keepdims=True)
    var = jnp.mean((pre - mean) ** 2, axis=-1, keepdims=True)
    h_target = (pre - mean) / jnp.sqrt(var + LN_EPS) * params["gamma"] + params["beta"]
    tau = 0.2 + 1.8 * jax.nn.sigmoid(h_target @ params["W_tau"].T + params["b_tau"])
    return h_prev + dt / tau * (h_target - h_prev)


if __name__ == "__main__":
    key = jax.random.PRNGKey(0)
    k_x, k_h, k_p = jax.random.split(key, 3)

    batch, input_size, hidden_size = 8, 16, 32
    x = jax.random.normal(k_x, (batch, input_size), jnp.float32)
    h_prev = jax.random.normal(k_h, (batch, hidden_size), jnp.float32)
    params = init_params(k_p, input_size, hidden_size)

    h_ref = reference_forward(x, h_prev, params, dt=0.1)

    # f32-weight path: faithful to the module, tight tolerance.
    prep_f32 = prepare_params(params, weight_dtype=jnp.float32)
    h_f32 = jax.block_until_ready(simple_liquid_cell(x, h_prev, prep_f32, dt=0.1))
    assert h_f32.shape == (batch, hidden_size)
    assert jnp.allclose(h_f32, h_ref, atol=1e-5, rtol=1e-5), "f32 mismatch vs reference"

    # bf16-weight path: bf16 activations/weights on the MXU, f32 accumulation.
    prep_bf16 = prepare_params(params, weight_dtype=jnp.bfloat16)
    h_bf16 = jax.block_until_ready(simple_liquid_cell(x, h_prev, prep_bf16, dt=0.1))
    assert h_bf16.shape == (batch, hidden_size)
    assert jnp.allclose(h_bf16, h_ref, atol=1e-2, rtol=1e-2), "bf16 mismatch vs reference"

    print("KERNEL_OK")
</pallas_src>

<mosaic_0001>
module attributes {stable_mosaic.version = 11 : i64} {
  func.func @liquid_cell_kernel(%arg0: i32, %arg1: memref<8x128xf32, #tpu.memory_space<vmem>>, %arg2: memref<8x128xf32, #tpu.memory_space<vmem>>, %arg3: memref<128x128xf32, #tpu.memory_space<vmem>>, %arg4: memref<128x128xf32, #tpu.memory_space<vmem>>, %arg5: memref<128x128xf32, #tpu.memory_space<vmem>>, %arg6: memref<8x128xf32, #tpu.memory_space<vmem>>, %arg7: memref<8x128xf32, #tpu.memory_space<vmem>>) attributes {dimension_semantics = [#tpu.dimension_semantics<parallel>], iteration_bounds = array<i64: 1>, scalar_prefetch = 0 : i64, scratch_operands = 0 : i64, tpu.core_type = #tpu.core_type<tc>, window_params = [{transform_indices = @transform_0, window_bounds = array<i64: 8, 128>}, {transform_indices = @transform_1, window_bounds = array<i64: 8, 128>}, {pipeline_mode = #tpu.pipeline_mode<synchronous>, transform_indices = @transform_2, window_bounds = array<i64: 128, 128>}, {pipeline_mode = #tpu.pipeline_mode<synchronous>, transform_indices = @transform_3, window_bounds = array<i64: 128, 128>}, {pipeline_mode = #tpu.pipeline_mode<synchronous>, transform_indices = @transform_4, window_bounds = array<i64: 128, 128>}, {pipeline_mode = #tpu.pipeline_mode<synchronous>, transform_indices = @transform_5, window_bounds = array<i64: 8, 128>}, {transform_indices = @transform_6, window_bounds = array<i64: 8, 128>}]} {
    %c0 = arith.constant 0 : index
    %c0_0 = arith.constant 0 : index
    %0 = vector.load %arg2[%c0, %c0_0] : memref<8x128xf32, #tpu.memory_space<vmem>>, vector<8x128xf32>
    %c0_1 = arith.constant 0 : index
    %c0_2 = arith.constant 0 : index
    %1 = vector.load %arg1[%c0_1, %c0_2] : memref<8x128xf32, #tpu.memory_space<vmem>>, vector<8x128xf32>
    %c0_3 = arith.constant 0 : index
    %c0_4 = arith.constant 0 : index
    %2 = vector.load %arg3[%c0_3, %c0_4] : memref<128x128xf32, #tpu.memory_space<vmem>>, vector<128x128xf32>
    %cst = arith.constant dense<0.000000e+00> : vector<8x128xf32>
    %3 = tpu.matmul %1, %2, %cst {dimension_numbers = #tpu.dot_dimension_numbers<[1], [0], [0], [1], [0, 0, 1, 1], [], []>} : vector<8x128xf32>, vector<128x128xf32>, vector<8x128xf32> -> vector<8x128xf32>
    %c0_5 = arith.constant 0 : index
    %c0_6 = arith.constant 0 : index
    %4 = vector.load %arg4[%c0_5, %c0_6] : memref<128x128xf32, #tpu.memory_space<vmem>>, vector<128x128xf32>
    %cst_7 = arith.constant dense<0.000000e+00> : vector<8x128xf32>
    %5 = tpu.matmul %0, %4, %cst_7 {dimension_numbers = #tpu.dot_dimension_numbers<[1], [0], [0], [1], [0, 0, 1, 1], [], []>} : vector<8x128xf32>, vector<128x128xf32>, vector<8x128xf32> -> vector<8x128xf32>
    %6 = arith.addf %3, %5 : vector<8x128xf32>
    %c0_8 = arith.constant 0 : index
    %c0_9 = arith.constant 0 : index
    %7 = vector.load %arg6[%c0_8, %c0_9] : memref<8x128xf32, #tpu.memory_space<vmem>>, vector<1x128xf32>
    %8 = vector.broadcast %7 : vector<1x128xf32> to vector<8x128xf32>
    %9 = arith.addf %6, %8 : vector<8x128xf32>
    %cst_10 = arith.constant dense<0.000000e+00> : vector<8xf32>
    %10 = vector.multi_reduction <add>, %9, %cst_10 [1] : vector<8x128xf32> to vector<8xf32>
    %11 = vector.shape_cast %10 : vector<8xf32> to vector<8x1xf32>
    %cst_11 = arith.constant 3.125000e-02 : f32
    %12 = vector.broadcast %cst_11 : f32 to vector<8x1xf32>
    %13 = arith.mulf %11, %12 : vector<8x1xf32>
    %14 = vector.broadcast %13 : vector<8x1xf32> to vector<8x128xf32>
    %15 = arith.subf %9, %14 : vector<8x128xf32>
    %16 = tpu.iota {dimensions = array<i32: 1>} : vector<1x128xi32>
    %c32_i32 = arith.constant 32 : i32
    %17 = vector.broadcast %c32_i32 : i32 to vector<1x128xi32>
    %18 = arith.cmpi slt, %16, %17 : vector<1x128xi32>
    %cst_12 = arith.constant 0.000000e+00 : f32
    %19 = vector.shape_cast %18 : vector<1x128xi1> to vector<1x128xi1>
    %20 = vector.broadcast %19 : vector<1x128xi1> to vector<8x128xi1>
    %21 = vector.broadcast %cst_12 : f32 to vector<8x128xf32>
    %22 = arith.select %20, %15, %21 : vector<8x128xi1>, vector<8x128xf32>
    %23 = arith.mulf %22, %22 : vector<8x128xf32>
    %cst_13 = arith.constant dense<0.000000e+00> : vector<8xf32>
    %24 = vector.multi_reduction <add>, %23, %cst_13 [1] : vector<8x128xf32> to vector<8xf32>
    %25 = vector.shape_cast %24 : vector<8xf32> to vector<8x1xf32>
    %cst_14 = arith.constant 3.125000e-02 : f32
    %26 = vector.broadcast %cst_14 : f32 to vector<8x1xf32>
    %27 = arith.mulf %25, %26 : vector<8x1xf32>
    %cst_15 = arith.constant 9.99999974E-6 : f32
    %28 = vector.broadcast %cst_15 : f32 to vector<8x1xf32>
    %29 = arith.addf %27, %28 : vector<8x1xf32>
    %30 = math.rsqrt %29 : vector<8x1xf32>
    %c1 = arith.constant 1 : index
    %c0_16 = arith.constant 0 : index
    %31 = vector.load %arg6[%c1, %c0_16] : memref<8x128xf32, #tpu.memory_space<vmem>>, vector<1x128xf32>
    %32 = vector.broadcast %30 : vector<8x1xf32> to vector<8x128xf32>
    %33 = vector.broadcast %31 : vector<1x128xf32> to vector<8x128xf32>
    %34 = arith.mulf %32, %33 : vector<8x128xf32>
    %35 = arith.mulf %22, %34 : vector<8x128xf32>
    %c2 = arith.constant 2 : index
    %c0_17 = arith.constant 0 : index
    %36 = vector.load %arg6[%c2, %c0_17] : memref<8x128xf32, #tpu.memory_space<vmem>>, vector<1x128xf32>
    %37 = vector.broadcast %36 : vector<1x128xf32> to vector<8x128xf32>
    %38 = arith.addf %35, %37 : vector<8x128xf32>
    %c0_18 = arith.constant 0 : index
    %c0_19 = arith.constant 0 : index
    %39 = vector.load %arg5[%c0_18, %c0_19] : memref<128x128xf32, #tpu.memory_space<vmem>>, vector<128x128xf32>
    %cst_20 = arith.constant dense<0.000000e+00> : vector<8x128xf32>
    %40 = tpu.matmul %38, %39, %cst_20 {dimension_numbers = #tpu.dot_dimension_numbers<[1], [0], [0], [1], [0, 0, 1, 1], [], []>} : vector<8x128xf32>, vector<128x128xf32>, vector<8x128xf32> -> vector<8x128xf32>
    %c3 = arith.constant 3 : index
    %c0_21 = arith.constant 0 : index
    %41 = vector.load %arg6[%c3, %c0_21] : memref<8x128xf32, #tpu.memory_space<vmem>>, vector<1x128xf32>
    %42 = vector.broadcast %41 : vector<1x128xf32> to vector<8x128xf32>
    %43 = arith.addf %40, %42 : vector<8x128xf32>
    %cst_22 = arith.constant 0.000000e+00 : f32
    %44 = vector.broadcast %cst_22 : f32 to vector<8x128xf32>
    %45 = arith.subf %44, %43 : vector<8x128xf32>
    %cst_23 = arith.constant 6.000000e+01 : f32
    %46 = vector.broadcast %cst_23 : f32 to vector<8x128xf32>
    %47 = arith.minimumf %45, %46 : vector<8x128xf32>
    %48 = math.exp %47 : vector<8x128xf32>
    %cst_24 = arith.constant 1.000000e+00 : f32
    %49 = vector.broadcast %cst_24 : f32 to vector<8x128xf32>
    %50 = arith.addf %49, %48 : vector<8x128xf32>
    %cst_25 = arith.constant 1.000000e-01 : f32
    %51 = vector.broadcast %cst_25 : f32 to vector<8x128xf32>
    %52 = arith.mulf %51, %50 : vector<8x128xf32>
    %cst_26 = arith.constant 2.000000e-01 : f32
    %53 = vector.broadcast %cst_26 : f32 to vector<8x128xf32>
    %54 = arith.mulf %53, %48 : vector<8x128xf32>
    %cst_27 = arith.constant 2.000000e+00 : f32
    %55 = vector.broadcast %cst_27 : f32 to vector<8x128xf32>
    %56 = arith.addf %55, %54 : vector<8x128xf32>
    %57 = tpu.reciprocal %56 : vector<8x128xf32> -> vector<8x128xf32>
    %58 = arith.mulf %52, %57 : vector<8x128xf32>
    %59 = arith.subf %38, %0 : vector<8x128xf32>
    %60 = arith.mulf %58, %59 : vector<8x128xf32>
    %61 = arith.addf %0, %60 : vector<8x128xf32>
    %c0_28 = arith.constant 0 : index
    %c0_29 = arith.constant 0 : index
    %62 = vector.load %arg7[%c0_28, %c0_29] : memref<8x128xf32, #tpu.memory_space<vmem>>, vector<8x128xf32>
    tpu.vector_store %arg7[%c0_28, %c0_29], %61 {strides = array<i32>} : memref<8x128xf32, #tpu.memory_space<vmem>>, vector<8x128xf32>,
    return
  }
  func.func @transform_0(%arg0: i32) -> (i32, i32) {
    %c0_i32 = arith.constant 0 : i32
    %c0_i32_0 = arith.constant 0 : i32
    return %arg0, %c0_i32 : i32, i32
  }
  func.func @transform_1(%arg0: i32) -> (i32, i32) {
    %c0_i32 = arith.constant 0 : i32
    %c0_i32_0 = arith.constant 0 : i32
    return %arg0, %c0_i32 : i32, i32
  }
  func.func @transform_2(%arg0: i32) -> (i32, i32) {
    %c0_i32 = arith.constant 0 : i32
    %c0_i32_0 = arith.constant 0 : i32
    %c0_i32_1 = arith.constant 0 : i32
    return %c0_i32, %c0_i32_0 : i32, i32
  }
  func.func @transform_3(%arg0: i32) -> (i32, i32) {
    %c0_i32 = arith.constant 0 : i32
    %c0_i32_0 = arith.constant 0 : i32
    %c0_i32_1 = arith.constant 0 : i32
    return %c0_i32, %c0_i32_0 : i32, i32
  }
  func.func @transform_4(%arg0: i32) -> (i32, i32) {
    %c0_i32 = arith.constant 0 : i32
    %c0_i32_0 = arith.constant 0 : i32
    %c0_i32_1 = arith.constant 0 : i32
    return %c0_i32, %c0_i32_0 : i32, i32
  }
  func.func @transform_5(%arg0: i32) -> (i32, i32) {
    %c0_i32 = arith.constant 0 : i32
    %c0_i32_0 = arith.constant 0 : i32
    %c0_i32_1 = arith.constant 0 : i32
    return %c0_i32, %c0_i32_0 : i32, i32
  }
  func.func @transform_6(%arg0: i32) -> (i32, i32) {
    %c0_i32 = arith.constant 0 : i32
    %c0_i32_0 = arith.constant 0 : i32
    return %arg0, %c0_i32 : i32, i32
  }
}

module attributes {stable_mosaic.version = 11 : i64} {
  func.func @liquid_cell_kernel(%arg0: i32, %arg1: memref<8x128xf32, #tpu.memory_space<vmem>>, %arg2: memref<8x128xf32, #tpu.memory_space<vmem>>, %arg3: memref<128x128xf32, #tpu.memory_space<vmem>>, %arg4: memref<128x128xf32, #tpu.memory_space<vmem>>, %arg5: memref<128x128xf32, #tpu.memory_space<vmem>>, %arg6: memref<8x128xf32, #tpu.memory_space<vmem>>, %arg7: memref<8x128xf32, #tpu.memory_space<vmem>>) attributes {dimension_semantics = [#tpu.dimension_semantics<parallel>], iteration_bounds = array<i64: 1>, scalar_prefetch = 0 : i64, scratch_operands = 0 : i64, tpu.core_type = #tpu.core_type<tc>, window_params = [{transform_indices = @transform_0, window_bounds = array<i64: 8, 128>}, {transform_indices = @transform_1, window_bounds = array<i64: 8, 128>}, {pipeline_mode = #tpu.pipeline_mode<synchronous>, transform_indices = @transform_2, window_bounds = array<i64: 128, 128>}, {pipeline_mode = #tpu.pipeline_mode<synchronous>, transform_indices = @transform_3, window_bounds = array<i64: 128, 128>}, {pipeline_mode = #tpu.pipeline_mode<synchronous>, transform_indices = @transform_4, window_bounds = array<i64: 128, 128>}, {pipeline_mode = #tpu.pipeline_mode<synchronous>, transform_indices = @transform_5, window_bounds = array<i64: 8, 128>}, {transform_indices = @transform_6, window_bounds = array<i64: 8, 128>}]} {
    %c0 = arith.constant 0 : index
    %c0_0 = arith.constant 0 : index
    %0 = vector.load %arg2[%c0, %c0_0] : memref<8x128xf32, #tpu.memory_space<vmem>>, vector<8x128xf32>
    %c0_1 = arith.constant 0 : index
    %c0_2 = arith.constant 0 : index
    %1 = vector.load %arg1[%c0_1, %c0_2] : memref<8x128xf32, #tpu.memory_space<vmem>>, vector<8x128xf32>
    %c0_3 = arith.constant 0 : index
    %c0_4 = arith.constant 0 : index
    %2 = vector.load %arg3[%c0_3, %c0_4] : memref<128x128xf32, #tpu.memory_space<vmem>>, vector<128x128xf32>
    %cst = arith.constant dense<0.000000e+00> : vector<8x128xf32>
    %3 = tpu.matmul %1, %2, %cst {dimension_numbers = #tpu.dot_dimension_numbers<[1], [0], [0], [1], [0, 0, 1, 1], [], []>} : vector<8x128xf32>, vector<128x128xf32>, vector<8x128xf32> -> vector<8x128xf32>
    %c0_5 = arith.constant 0 : index
    %c0_6 = arith.constant 0 : index
    %4 = vector.load %arg4[%c0_5, %c0_6] : memref<128x128xf32, #tpu.memory_space<vmem>>, vector<128x128xf32>
    %cst_7 = arith.constant dense<0.000000e+00> : vector<8x128xf32>
    %5 = tpu.matmul %0, %4, %cst_7 {dimension_numbers = #tpu.dot_dimension_numbers<[1], [0], [0], [1], [0, 0, 1, 1], [], []>} : vector<8x128xf32>, vector<128x128xf32>, vector<8x128xf32> -> vector<8x128xf32>
    %6 = arith.addf %3, %5 : vector<8x128xf32>
    %c0_8 = arith.constant 0 : index
    %c0_9 = arith.constant 0 : index
    %7 = vector.load %arg6[%c0_8, %c0_9] : memref<8x128xf32, #tpu.memory_space<vmem>>, vector<1x128xf32>
    %8 = vector.broadcast %7 : vector<1x128xf32> to vector<8x128xf32>
    %9 = arith.addf %6, %8 : vector<8x128xf32>
    %cst_10 = arith.constant dense<0.000000e+00> : vector<8xf32>
    %10 = vector.multi_reduction <add>, %9, %cst_10 [1] : vector<8x128xf32> to vector<8xf32>
    %11 = vector.shape_cast %10 : vector<8xf32> to vector<8x1xf32>
    %cst_11 = arith.constant 3.125000e-02 : f32
    %12 = vector.broadcast %cst_11 : f32 to vector<8x1xf32>
    %13 = arith.mulf %11, %12 : vector<8x1xf32>
    %14 = vector.broadcast %13 : vector<8x1xf32> to vector<8x128xf32>
    %15 = arith.subf %9, %14 : vector<8x128xf32>
    %16 = tpu.iota {dimensions = array<i32: 1>} : vector<1x128xi32>
    %c32_i32 = arith.constant 32 : i32
    %17 = vector.broadcast %c32_i32 : i32 to vector<1x128xi32>
    %18 = arith.cmpi slt, %16, %17 : vector<1x128xi32>
    %cst_12 = arith.constant 0.000000e+00 : f32
    %19 = vector.shape_cast %18 : vector<1x128xi1> to vector<1x128xi1>
    %20 = vector.broadcast %19 : vector<1x128xi1> to vector<8x128xi1>
    %21 = vector.broadcast %cst_12 : f32 to vector<8x128xf32>
    %22 = arith.select %20, %15, %21 : vector<8x128xi1>, vector<8x128xf32>
    %23 = arith.mulf %22, %22 : vector<8x128xf32>
    %cst_13 = arith.constant dense<0.000000e+00> : vector<8xf32>
    %24 = vector.multi_reduction <add>, %23, %cst_13 [1] : vector<8x128xf32> to vector<8xf32>
    %25 = vector.shape_cast %24 : vector<8xf32> to vector<8x1xf32>
    %cst_14 = arith.constant 3.125000e-02 : f32
    %26 = vector.broadcast %cst_14 : f32 to vector<8x1xf32>
    %27 = arith.mulf %25, %26 : vector<8x1xf32>
    %cst_15 = arith.constant 9.99999974E-6 : f32
    %28 = vector.broadcast %cst_15 : f32 to vector<8x1xf32>
    %29 = arith.addf %27, %28 : vector<8x1xf32>
    %30 = math.rsqrt %29 : vector<8x1xf32>
    %c1 = arith.constant 1 : index
    %c0_16 = arith.constant 0 : index
    %31 = vector.load %arg6[%c1, %c0_16] : memref<8x128xf32, #tpu.memory_space<vmem>>, vector<1x128xf32>
    %32 = vector.broadcast %30 : vector<8x1xf32> to vector<8x128xf32>
    %33 = vector.broadcast %31 : vector<1x128xf32> to vector<8x128xf32>
    %34 = arith.mulf %32, %33 : vector<8x128xf32>
    %35 = arith.mulf %22, %34 : vector<8x128xf32>
    %c2 = arith.constant 2 : index
    %c0_17 = arith.constant 0 : index
    %36 = vector.load %arg6[%c2, %c0_17] : memref<8x128xf32, #tpu.memory_space<vmem>>, vector<1x128xf32>
    %37 = vector.broadcast %36 : vector<1x128xf32> to vector<8x128xf32>
    %38 = arith.addf %35, %37 : vector<8x128xf32>
    %c0_18 = arith.constant 0 : index
    %c0_19 = arith.constant 0 : index
    %39 = vector.load %arg5[%c0_18, %c0_19] : memref<128x128xf32, #tpu.memory_space<vmem>>, vector<128x128xf32>
    %cst_20 = arith.constant dense<0.000000e+00> : vector<8x128xf32>
    %40 = tpu.matmul %38, %39, %cst_20 {dimension_numbers = #tpu.dot_dimension_numbers<[1], [0], [0], [1], [0, 0, 1, 1], [], []>} : vector<8x128xf32>, vector<128x128xf32>, vector<8x128xf32> -> vector<8x128xf32>
    %c3 = arith.constant 3 : index
    %c0_21 = arith.constant 0 : index
    %41 = vector.load %arg6[%c3, %c0_21] : memref<8x128xf32, #tpu.memory_space<vmem>>, vector<1x128xf32>
    %42 = vector.broadcast %41 : vector<1x128xf32> to vector<8x128xf32>
    %43 = arith.addf %40, %42 : vector<8x128xf32>
    %cst_22 = arith.constant 0.000000e+00 : f32
    %44 = vector.broadcast %cst_22 : f32 to vector<8x128xf32>
    %45 = arith.subf %44, %43 : vector<8x128xf32>
    %cst_23 = arith.constant 6.000000e+01 : f32
    %46 = vector.broadcast %cst_23 : f32 to vector<8x128xf32>
    %47 = arith.minimumf %45, %46 : vector<8x128xf32>
    %48 = math.exp %47 : vector<8x128xf32>
    %cst_24 = arith.constant 1.000000e+00 : f32
    %49 = vector.broadcast %cst_24 : f32 to vector<8x128xf32>
    %50 = arith.addf %49, %48 : vector<8x128xf32>
    %cst_25 = arith.constant 1.000000e-01 : f32
    %51 = vector.broadcast %cst_25 : f32 to vector<8x128xf32>
    %52 = arith.mulf %51, %50 : vector<8x128xf32>
    %cst_26 = arith.constant 2.000000e-01 : f32
    %53 = vector.broadcast %cst_26 : f32 to vector<8x128xf32>
    %54 = arith.mulf %53, %48 : vector<8x128xf32>
    %cst_27 = arith.constant 2.000000e+00 : f32
    %55 = vector.broadcast %cst_27 : f32 to vector<8x128xf32>
    %56 = arith.addf %55, %54 : vector<8x128xf32>
    %57 = tpu.reciprocal %56 : vector<8x128xf32> -> vector<8x128xf32>
    %58 = arith.mulf %52, %57 : vector<8x128xf32>
    %59 = arith.subf %38, %0 : vector<8x128xf32>
    %60 = arith.mulf %58, %59 : vector<8x128xf32>
    %61 = arith.addf %0, %60 : vector<8x128xf32>
    %c0_28 = arith.constant 0 : index
    %c0_29 = arith.constant 0 : index
    %62 = vector.load %arg7[%c0_28, %c0_29] : memref<8x128xf32, #tpu.memory_space<vmem>>, vector<8x128xf32>
    tpu.vector_store %arg7[%c0_28, %c0_29], %61 {strides = array<i32>} : memref<8x128xf32, #tpu.memory_space<vmem>>, vector<8x128xf32>,
    return
  }
  func.func @transform_0(%arg0: i32) -> (i32, i32) {
    %c0_i32 = arith.constant 0 : i32
    %c0_i32_0 = arith.constant 0 : i32
    return %arg0, %c0_i32 : i32, i32
  }
  func.func @transform_1(%arg0: i32) -> (i32, i32) {
    %c0_i32 = arith.constant 0 : i32
    %c0_i32_0 = arith.constant 0 : i32
    return %arg0, %c0_i32 : i32, i32
  }
  func.func @transform_2(%arg0: i32) -> (i32, i32) {
    %c0_i32 = arith.constant 0 : i32
    %c0_i32_0 = arith.constant 0 : i32
    %c0_i32_1 = arith.constant 0 : i32
    return %c0_i32, %c0_i32_0 : i32, i32
  }
  func.func @transform_3(%arg0: i32) -> (i32, i32) {
    %c0_i32 = arith.constant 0 : i32
    %c0_i32_0 = arith.constant 0 : i32
    %c0_i32_1 = arith.constant 0 : i32
    return %c0_i32, %c0_i32_0 : i32, i32
  }
  func.func @transform_4(%arg0: i32) -> (i32, i32) {
    %c0_i32 = arith.constant 0 : i32
    %c0_i32_0 = arith.constant 0 : i32
    %c0_i32_1 = arith.constant 0 : i32
    return %c0_i32, %c0_i32_0 : i32, i32
  }
  func.func @transform_5(%arg0: i32) -> (i32, i32) {
    %c0_i32 = arith.constant 0 : i32
    %c0_i32_0 = arith.constant 0 : i32
    %c0_i32_1 = arith.constant 0 : i32
    return %c0_i32, %c0_i32_0 : i32, i32
  }
  func.func @transform_6(%arg0: i32) -> (i32, i32) {
    %c0_i32 = arith.constant 0 : i32
    %c0_i32_0 = arith.constant 0 : i32
    return %arg0, %c0_i32 : i32, i32
  }
}

</mosaic_0001>

<bundles_post_ra>
// kernel: tpu_custom_call.1
= control target key start
LH: loop header
LB: loop body
LE: loop exit
PB: predicated region body
PF: predicated region fallthrough
CT: control target
= control target key end

     0   :  { %11 = vsyncpa [#allocation3], 0  ;;  %s982_s0 = inlined_call_operand.hbm [shape: f32[8,128], index: 0, kind: input, shape index: {}]   ;;  %s983_s1 = inlined_call_operand.hbm [shape: f32[8,128], index: 1, kind: input, shape index: {}]   ;;  %s984_s2 = inlined_call_operand.hbm [shape: f32[128,128], index: 2, kind: input, shape index: {}]   ;;  %s985_s3 = inlined_call_operand.hbm [shape: f32[128,128], index: 3, kind: input, shape index: {}]   ;;  %s986_s4 = inlined_call_operand.hbm [shape: f32[128,128], index: 4, kind: input, shape index: {}]   ;;  %s987_s5 = inlined_call_operand.vmem [shape: f32[8,128], index: 5, kind: input, shape index: {}]   ;;  %s988_s6 = inlined_call_operand.hbm [shape: f32[8,128], index: 6, kind: output, shape index: {}]  }
   0x1   :  { %12 = vsyncpa [#allocation6], 0 }
   0x2   :  { %13 = vsyncpa [#allocation9], 0 }
   0x3   :  { %14 = vsyncpa [#allocation4], 0  ;;  %s808_s21 = smov [#allocation5]   ;;  %s668_s25 = scalar_lea.hbm %s983_s1, 128 }
   0x4   :  { %s31_s22 = sshll.u32 %s808_s21, 4  ;;  %p669_p0 = scmp.ne.s32.totalorder %s983_s1, %s668_s25  ;;  %s32_s22 = int_to_ptr.vmem [resolvable:$true] %s31_s22 }
   0x5   :  { %p672_p1 = scmp.lt.u32.totalorder %s668_s25, %s983_s1 }
   0x7   :  { %p674_p2 = pnand %p672_p1, %p669_p0 }
   0x9   :  { %677 = shalt.err (!%p674_p2)
}
   0xa   :  { %s678_s30 = scalar_lea.vmem %s32_s22, 128  ;;  %p683_p4 = scmp.lt.s32.totalorder %s32_s22, %s32_s22 }
   0xb   :  { %p679_p3 = scmp.ne.s32.totalorder %s32_s22, %s678_s30  ;;  %p684_p5 = scmp.lt.s32.totalorder %s678_s30, %s678_s30 }
   0xd   :  { %p685_p6 = por %p684_p5, %p683_p4 }
   0xf   :  { %p686_p7 = pnand %p685_p6, %p679_p3 }
  0x11   :  { %689 = shalt.err (!%p686_p7)
}
  0x12   :  { %34 = dma.hbm_to_vmem [thread:$0]  %s983_s1, 128, %s32_s22, [#allocation6]  }
  0x13   :  { %s809_s9 = smov [#allocation8]   ;;  %s810_s11 = smov [#allocation2]  }
  0x14   :  { %s52_s10 = sshll.u32 %s809_s9, 4  ;;  %s21_s12 = sshll.u32 %s810_s11, 4  ;;  %s53_s10 = int_to_ptr.vmem [resolvable:$true] %s52_s10  ;;  %s22_s12 = int_to_ptr.vmem [resolvable:$true] %s21_s12 }
  0x15   :  { %s690_s15 = scalar_lea.hbm %s985_s3, 2048 }
  0x16   :  { %p691_p8 = scmp.ne.s32.totalorder %s985_s3, %s690_s15  ;;  %p694_p9 = scmp.lt.u32.totalorder %s690_s15, %s985_s3 }
  0x18   :  { %p696_p10 = pnand %p694_p9, %p691_p8 }
  0x1a   :  { %699 = shalt.err (!%p696_p10)
}
  0x1b   :  { %s700_s1 = scalar_lea.vmem %s53_s10, 2048  ;;  %p705_p12 = scmp.lt.s32.totalorder %s53_s10, %s53_s10 }
  0x1c   :  { %p701_p11 = scmp.ne.s32.totalorder %s53_s10, %s700_s1  ;;  %p706_p13 = scmp.lt.s32.totalorder %s700_s1, %s700_s1 }
  0x1e   :  { %p707_p0 = por %p706_p13, %p705_p12 }
  0x20   :  { %p708_p1 = pnand %p707_p0, %p701_p11 }
  0x22   :  { %711 = shalt.err (!%p708_p1)
}
  0x23   :  { %s811_s20 = smov 128   ;;  %s812_s21 = smov 8  }
  0x24   :  { %58 = dma.hbm_to_vmem [thread:$0]  %s985_s3, 2048, %s53_s10, [#allocation9], %s811_s20, %s811_s20, %s812_s21  }
  0x25   :  { %s712_s26 = scalar_lea.hbm %s982_s0, 128 }
  0x26   :  { %p713_p2 = scmp.ne.s32.totalorder %s982_s0, %s712_s26  ;;  %p716_p3 = scmp.lt.u32.totalorder %s712_s26, %s982_s0 }
  0x28   :  { %p718_p4 = pnand %p716_p3, %p713_p2 }
  0x2a   :  { %721 = shalt.err (!%p718_p4)
}
  0x2b   :  { %s722_s7 = scalar_lea.vmem %s22_s12, 128  ;;  %p727_p6 = scmp.lt.s32.totalorder %s22_s12, %s22_s12 }
  0x2c   :  { %p723_p5 = scmp.ne.s32.totalorder %s22_s12, %s722_s7  ;;  %p728_p7 = scmp.lt.s32.totalorder %s722_s7, %s722_s7 }
  0x2e   :  { %p729_p8 = por %p728_p7, %p727_p6 }
  0x30   :  { %p730_p9 = pnand %p729_p8, %p723_p5 }
  0x32   :  { %733 = shalt.err (!%p730_p9)
}
  0x33   :  { %24 = dma.hbm_to_vmem [thread:$0]  %s982_s0, 128, %s22_s12, [#allocation3]  }
  0x34   :  { %s813_s9 = smov [#allocation7]   ;;  %s814_s11 = smov [#allocation10]  }
  0x35   :  { %s40_s10 = sshll.u32 %s813_s9, 4  ;;  %s64_s13 = sshll.u32 %s814_s11, 4  ;;  %s41_s10 = int_to_ptr.vmem [resolvable:$true] %s40_s10  ;;  %s65_s13 = int_to_ptr.vmem [resolvable:$true] %s64_s13 }
  0x36   :  { %s734_s16 = scalar_lea.hbm %s984_s2, 2048 }
  0x37   :  { %p735_p10 = scmp.ne.s32.totalorder %s984_s2, %s734_s16  ;;  %p738_p11 = scmp.lt.u32.totalorder %s734_s16, %s984_s2 }
  0x39   :  { %p740_p12 = pnand %p738_p11, %p735_p10 }
  0x3b   :  { %743 = shalt.err (!%p740_p12)
}
  0x3c   :  { %s744_s0 = scalar_lea.vmem %s41_s10, 2048  ;;  %p749_p0 = scmp.lt.s32.totalorder %s41_s10, %s41_s10 }
  0x3d   :  { %p745_p13 = scmp.ne.s32.totalorder %s41_s10, %s744_s0  ;;  %p750_p1 = scmp.lt.s32.totalorder %s744_s0, %s744_s0 }
  0x3f   :  { %p751_p2 = por %p750_p1, %p749_p0 }
  0x41   :  { %p752_p3 = pnand %p751_p2, %p745_p13 }
  0x43   :  { %755 = shalt.err (!%p752_p3)
}
  0x44   :  { %46 = dma.hbm_to_vmem [thread:$0]  %s984_s2, 2048, %s41_s10, [#allocation6], %s811_s20, %s811_s20, %s812_s21  }
  0x45   :  { %s756_s25 = scalar_lea.hbm %s986_s4, 2048 }
  0x46   :  { %p757_p4 = scmp.ne.s32.totalorder %s986_s4, %s756_s25  ;;  %p760_p5 = scmp.lt.u32.totalorder %s756_s25, %s986_s4 }
  0x48   :  { %p762_p6 = pnand %p760_p5, %p757_p4 }
  0x4a   :  { %765 = shalt.err (!%p762_p6)
}
  0x4b   :  { %s766_s30 = scalar_lea.vmem %s65_s13, 2048  ;;  %p771_p8 = scmp.lt.s32.totalorder %s65_s13, %s65_s13 }
  0x4c   :  { %p767_p7 = scmp.ne.s32.totalorder %s65_s13, %s766_s30  ;;  %p772_p9 = scmp.lt.s32.totalorder %s766_s30, %s766_s30 }
  0x4e   :  { %p773_p10 = por %p772_p9, %p771_p8 }
  0x50   :  { %p774_p11 = pnand %p773_p10, %p767_p7 }
  0x52   :  { %777 = shalt.err (!%p774_p11)
}
  0x53   :  { %70 = dma.hbm_to_vmem [thread:$0]  %s986_s4, 2048, %s65_s13, [#allocation9], %s811_s20, %s811_s20, %s812_s21  }
  0x54   :  { %800 = dma.done.wait [#allocation3], 128  }
  0x55   :  { %801 = vsyncadd [#allocation3], 4294967168 }
  0x56   :  { %802 = dma.done.wait [#allocation6], 2176  }
  0x57   :  { %803 = vsyncadd [#allocation6], 4294965120 }
  0x58   :  { %804 = dma.done.wait [#allocation9], 4096  }
  0x59   :  { %805 = vsyncadd [#allocation9], 4294963200  ;;  %v815_v0 = vmov 0.0|0.0   ;;  %vm816_vm0 = vmmov 0   ;;  %v817_v1 = vmov 0.0   ;;  %v106_v2 = vld [vmem:[#allocation8] sm:$0xff] }
  0x5a   :  { %579 = vmatprep.subr.bf16.mxu0 %v815_v0  ;;  %603 = vmatprep.subr.bf16.mxu1 %v815_v0  ;;  %v107_v3 = vld [vmem:[#allocation8 + $0x8] sm:$0xff]  ;;  %v90_v4 = vld [vmem:[#allocation7] sm:$0xff]  ;;  %v108_v7 = vld [vmem:[#allocation8 + $0x10] sm:$0xff]  ;;  %s818_s13 = smov [#allocation11]  }
  0x5b   :  { %506 = vmatprep.mubr.msk.f32.mxu0 %vm816_vm0, %v817_v1  ;;  %541 = vmatprep.mubr.msk.f32.mxu1 %vm816_vm0, %v817_v1  ;;  %v580_v5 = vpack.c.bf16 %v107_v3, %v106_v2  ;;  %v91_v6 = vld [vmem:[#allocation7 + $0x8] sm:$0xff]  ;;  %v109_v8 = vld [vmem:[#allocation8 + $0x18] sm:$0xff]  ;;  %v92_v10 = vld [vmem:[#allocation7 + $0x10] sm:$0xff]  ;;  %s408_s14 = sshll.u32 %s818_s13, 4  ;;  %s409_s14 = int_to_ptr.vmem [resolvable:$true] %s408_s14 }
  0x5c   :  { %v604_v9 = vpack.c.bf16 %v91_v6, %v90_v4  ;;  %v93_v11 = vld [vmem:[#allocation7 + $0x18] sm:$0xff]  ;;  %v583_v12 = vpack.c.bf16 %v109_v8, %v108_v7  ;;  %v110_v14 = vld [vmem:[#allocation8 + $0x20] sm:$0xff]  ;;  %v111_v15 = vld [vmem:[#allocation8 + $0x28] sm:$0xff]  ;;  %p783_p13 = scmp.lt.s32.totalorder %s409_s14, %s409_s14 }
  0x5d   :  { %581 = vmatpush3.bf16.msra.mxu0 %v580_v5  ;;  %v607_v13 = vpack.c.bf16 %v93_v11, %v92_v10  ;;  %v94_v16 = vld [vmem:[#allocation7 + $0x20] sm:$0xff]  ;;  %v95_v17 = vld [vmem:[#allocation7 + $0x28] sm:$0xff]  ;;  %v586_v18 = vpack.c.bf16 %v111_v15, %v110_v14  ;;  %v112_v20 = vld [vmem:[#allocation8 + $0x30] sm:$0xff]  ;;  %v272_v5 = vlaneseq }
  0x5e   :  { %605 = vmatpush3.bf16.msra.mxu1 %v604_v9  ;;  %582 = vmatprep.subr.bf16.mxu0 %v815_v0  ;;  %v610_v19 = vpack.c.bf16 %v95_v17, %v94_v16  ;;  %v113_v21 = vld [vmem:[#allocation8 + $0x38] sm:$0xff]  ;;  %v96_v22 = vld [vmem:[#allocation7 + $0x30] sm:$0xff]  ;;  %v114_v26 = vld [vmem:[#allocation8 + $0x40] sm:$0xff] }
  0x5f   :  { %606 = vmatprep.subr.bf16.mxu1 %v815_v0  ;;  %v97_v23 = vld [vmem:[#allocation7 + $0x38] sm:$0xff]  ;;  %v589_v24 = vpack.c.bf16 %v113_v21, %v112_v20  ;;  %v115_v27 = vld [vmem:[#allocation8 + $0x48] sm:$0xff]  ;;  %v98_v28 = vld [vmem:[#allocation7 + $0x40] sm:$0xff]  ;;  %v273_v6 = vand.u32 127, %v272_v5 }
  0x60   :  { %v613_v25 = vpack.c.bf16 %v97_v23, %v96_v22  ;;  %v99_v29 = vld [vmem:[#allocation7 + $0x48] sm:$0xff]  ;;  %v592_v30 = vpack.c.bf16 %v115_v27, %v114_v26  ;;  %v116_v32 = vld [vmem:[#allocation8 + $0x50] sm:$0xff]  ;;  %v117_v33 = vld [vmem:[#allocation8 + $0x58] sm:$0xff] }
  0x61   :  { %584 = vmatpush3.bf16.msra.mxu0 %v583_v12  ;;  %v616_v31 = vpack.c.bf16 %v99_v29, %v98_v28  ;;  %v100_v34 = vld [vmem:[#allocation7 + $0x50] sm:$0xff]  ;;  %v101_v35 = vld [vmem:[#allocation7 + $0x58] sm:$0xff]  ;;  %v595_v36 = vpack.c.bf16 %v117_v33, %v116_v32  ;;  %v118_v38 = vld [vmem:[#allocation8 + $0x60] sm:$0xff]  ;;  %vm274_vm1 = vcmp.lt.s32.totalorder %v273_v6, 32 }
  0x62   :  { %608 = vmatpush3.bf16.msra.mxu1 %v607_v13  ;;  %585 = vmatprep.subr.bf16.mxu0 %v815_v0  ;;  %v619_v37 = vpack.c.bf16 %v101_v35, %v100_v34  ;;  %v119_v39 = vld [vmem:[#allocation8 + $0x68] sm:$0xff]  ;;  %v102_v40 = vld [vmem:[#allocation7 + $0x60] sm:$0xff]  ;;  %v120_v44 = vld [vmem:[#allocation8 + $0x70] sm:$0xff] }
  0x63   :  { %609 = vmatprep.subr.bf16.mxu1 %v815_v0  ;;  %v103_v41 = vld [vmem:[#allocation7 + $0x68] sm:$0xff]  ;;  %v598_v42 = vpack.c.bf16 %v119_v39, %v118_v38  ;;  %v121_v45 = vld [vmem:[#allocation8 + $0x78] sm:$0xff]  ;;  %v104_v46 = vld [vmem:[#allocation7 + $0x70] sm:$0xff] }
  0x64   :  { %v622_v43 = vpack.c.bf16 %v103_v41, %v102_v40  ;;  %v105_v47 = vld [vmem:[#allocation7 + $0x78] sm:$0xff]  ;;  %v601_v48 = vpack.c.bf16 %v121_v45, %v120_v44  ;;  %v89_v51 = vld [vmem:[#allocation2] sm:$0xff]  ;;  %v297_v59 = vld [vmem:[#allocation10] sm:$0xff] }
  0x65   :  { %587 = vmatpush3.bf16.msra.mxu0 %v586_v18  ;;  %v625_v49 = vpack.c.bf16 %v105_v47, %v104_v46  ;;  %v943_v50 = vld [vmem:[#allocation5] sm:$0xff]  ;;  %v419_v55 = vld [vmem:[%s987_s5] ss:$0 sm:$0xff]  ;;  %v298_v60 = vld [vmem:[#allocation10 + $0x8] sm:$0xff] }
  0x66   :  { %611 = vmatpush3.bf16.msra.mxu1 %v610_v19  ;;  %588 = vmatprep.subr.bf16.mxu0 %v815_v0  ;;  %v299_v61 = vld [vmem:[#allocation10 + $0x10] sm:$0xff]  ;;  %v628_v62 = vpack.c.bf16 %v298_v60, %v297_v59  ;;  %v300_v63 = vld [vmem:[#allocation10 + $0x18] sm:$0xff]  ;;  %v302_v3 = vld [vmem:[#allocation10 + $0x28] sm:$0xff] }
  0x67   :  { %612 = vmatprep.subr.bf16.mxu1 %v815_v0  ;;  %v631_v2 = vpack.c.bf16 %v300_v63, %v299_v61  ;;  %v303_v12 = vld [vmem:[#allocation10 + $0x30] sm:$0xff]  ;;  %v304_v13 = vld [vmem:[#allocation10 + $0x38] sm:$0xff]  ;;  %v305_v15 = vld [vmem:[#allocation10 + $0x40] sm:$0xff] }
  0x68   :  { %v637_v14 = vpack.c.bf16 %v304_v13, %v303_v12  ;;  %v306_v16 = vld [vmem:[#allocation10 + $0x48] sm:$0xff]  ;;  %v307_v18 = vld [vmem:[#allocation10 + $0x50] sm:$0xff]  ;;  %v308_v19 = vld [vmem:[#allocation10 + $0x58] sm:$0xff] }
  0x69   :  { %590 = vmatpush3.bf16.msra.mxu0 %v589_v24  ;;  %v640_v17 = vpack.c.bf16 %v306_v16, %v305_v15  ;;  %v643_v20 = vpack.c.bf16 %v308_v19, %v307_v18  ;;  %v309_v21 = vld [vmem:[#allocation10 + $0x60] sm:$0xff]  ;;  %v310_v22 = vld [vmem:[#allocation10 + $0x68] sm:$0xff]  ;;  %v311_v24 = vld [vmem:[#allocation10 + $0x70] sm:$0xff] }
  0x6a   :  { %614 = vmatpush3.bf16.msra.mxu1 %v613_v25  ;;  %591 = vmatprep.subr.bf16.mxu0 %v815_v0  ;;  %v646_v23 = vpack.c.bf16 %v310_v22, %v309_v21  ;;  %v312_v25 = vld [vmem:[#allocation10 + $0x78] sm:$0xff]  ;;  %v421_v33 = vld [vmem:[%s987_s5 + $0x2] ss:$0 sm:$0xff] }
  0x6b   :  { %615 = vmatprep.subr.bf16.mxu1 %v815_v0  ;;  %v649_v26 = vpack.c.bf16 %v312_v25, %v311_v24 }
  0x6d   :  { %593 = vmatpush3.bf16.msra.mxu0 %v592_v30  ;;  %v420_v30 = vld [vmem:[%s987_s5 + $0x1] ss:$0 sm:$0xff] }
  0x6e   :  { %617 = vmatpush3.bf16.msra.mxu1 %v616_v31  ;;  %594 = vmatprep.subr.bf16.mxu0 %v815_v0 }
  0x6f   :  { %618 = vmatprep.subr.bf16.mxu1 %v815_v0 }
  0x71   :  { %596 = vmatpush3.bf16.msra.mxu0 %v595_v36 }
  0x72   :  { %620 = vmatpush3.bf16.msra.mxu1 %v619_v37  ;;  %597 = vmatprep.subr.bf16.mxu0 %v815_v0 }
  0x73   :  { %621 = vmatprep.subr.bf16.mxu1 %v815_v0 }
  0x75   :  { %599 = vmatpush3.bf16.msra.mxu0 %v598_v42 }
  0x76   :  { %623 = vmatpush3.bf16.msra.mxu1 %v622_v43  ;;  %600 = vmatprep.subr.bf16.mxu0 %v815_v0 }
  0x77   :  { %624 = vmatprep.subr.bf16.mxu1 %v815_v0 }
  0x79   :  { %602 = vmatpush3.bf16.msra.mxu0 %v601_v48 }
  0x7a   :  { %626 = vmatpush3.bf16.msra.mxu1 %v625_v49  ;;  %627 = vmatprep.subr.bf16.mxu0 %v815_v0 }
  0x7c   :  { %507 = vmatmul.mubr.f32.vlgmr.msra.gmra.mrb[0].mxu0 %v943_v50 }
  0x7d   :  { %542 = vmatmul.mubr.f32.vlgmr.msra.gmra.mrb[0].mxu1 %v89_v51  ;;  %576 = vmatprep.mubr.msk.f32.mxu0 %vm816_vm0, %v817_v1  ;;  %v301_v1 = vld [vmem:[#allocation10 + $0x20] sm:$0xff] }
  0x7e   :  { %629 = vmatpush3.bf16.msra.mxu0 %v628_v62  ;;  %v634_v4 = vpack.c.bf16 %v302_v3, %v301_v1 }
  0x7f   :  { %630 = vmatprep.subr.bf16.mxu0 %v815_v0 }
  0x82   :  { %632 = vmatpush3.bf16.msra.mxu0 %v631_v2 }
  0x83   :  { %633 = vmatprep.subr.bf16.mxu0 %v815_v0 }
  0x86   :  { %635 = vmatpush3.bf16.msra.mxu0 %v634_v4 }
  0x87   :  { %636 = vmatprep.subr.bf16.mxu0 %v815_v0 }
  0x8a   :  { %638 = vmatpush3.bf16.msra.mxu0 %v637_v14 }
  0x8b   :  { %639 = vmatprep.subr.bf16.mxu0 %v815_v0 }
  0x8e   :  { %641 = vmatpush3.bf16.msra.mxu0 %v640_v17 }
  0x8f   :  { %642 = vmatprep.subr.bf16.mxu0 %v815_v0 }
  0x92   :  { %644 = vmatpush3.bf16.msra.mxu0 %v643_v20 }
  0x93   :  { %645 = vmatprep.subr.bf16.mxu0 %v815_v0 }
  0x96   :  { %647 = vmatpush3.bf16.msra.mxu0 %v646_v23 }
  0x97   :  { %648 = vmatprep.subr.bf16.mxu0 %v815_v0  ;;  %v422_v0 = vld [vmem:[%s987_s5 + $0x3] ss:$0 sm:$0xff]  ;;  %s778_s5 = scalar_lea.vmem %s409_s14, 128 }
  0x98   :  { %p779_p12 = scmp.ne.s32.totalorder %s409_s14, %s778_s5  ;;  %p784_p0 = scmp.lt.s32.totalorder %s778_s5, %s778_s5 }
  0x9a   :  { %650 = vmatpush3.bf16.msra.mxu0 %v649_v26  ;;  %p785_p1 = por %p784_p0, %p783_p13 }
  0x9c   :  { %p786_p2 = pnand %p785_p1, %p779_p12 }
 0x14f   :  { %v188_v52 = vpop.f32.mrb[0].mxu0 }
 0x150   :  { %v258_v53 = vpop.f32.mrb[0].mxu1  ;;  %v508_v54 = vpop.f32.mrb[1].mxu0 }
 0x151   :  { %v259_v56 = vadd.f32 %v258_v53, %v188_v52  ;;  %v543_v57 = vpop.f32.mrb[1].mxu1 }
 0x153   :  { %v267_v58 = vadd.f32 %v419_v55, %v259_v56 }
 0x155   :  { %268 = vadd.xlane.f32.xlu0 %v267_v58 }
 0x1e2   :  { %v269_v7 = vpop.xlane.xlu0 %268 }
 0x1e3   :  { %v270_v8 = vmul.f32 0.03125, %v269_v7 }
 0x1e5   :  { %v271_v9 = vsub.f32 %v267_v58, %v270_v8 }
 0x1e7   :  { %v277_v10 = vsel %vm274_vm1, %v271_v9, 0.0 }
 0x1e8   :  { %v278_v11 = vmul.f32 %v277_v10, %v277_v10 }
 0x1ea   :  { %279 = vadd.xlane.f32.xlu0 %v278_v11 }
 0x277   :  { %v280_v27 = vpop.xlane.xlu0 %279 }
 0x278   :  { %v281_v28 = vmul.f32 0.03125, %v280_v27 }
 0x27a   :  { %v282_v29 = vadd.f32 1e-05, %v281_v28 }
 0x27c   :  { %662 = vrsqrt.f32 %v282_v29 }
 0x286   :  { %v663_v31 = vpop.eup %662 }
 0x287   :  { %v289_v32 = vmul.f32 %v663_v31, %v420_v30 }
 0x289   :  { %v290_v34 = vmul.f32 %v289_v32, %v277_v10 }
 0x28b   :  { %v296_v35 = vadd.f32 %v421_v33, %v290_v34 }
 0x28d   :  { %577 = vmatmul.mubr.f32.vlgmr.msra.gmra.mrb[2].mxu0 %v296_v35  ;;  %v398_v49 = vsub.f32 %v296_v35, %v943_v50 }
 0x360   :  { %v384_v36 = vpop.f32.mrb[2].mxu0 }
 0x361   :  { %v385_v37 = vadd.f32 %v422_v0, %v384_v36  ;;  %v578_v38 = vpop.f32.mrb[3].mxu0 }
 0x363   :  { %v388_v39 = vsub.f32 0.0, %v385_v37 }
 0x365   :  { %v389_v40 = vmin.f32 %v388_v39, 60.0 }
 0x367   :  { %v390_v41 = vmul.f32 1.442695, %v389_v40 }
 0x369   :  { %664 = vpow2.f32 %v390_v41 }
 0x373   :  { %v665_v42 = vpop.eup %664 }
 0x374   :  { %v394_v43 = vmul.f32 0.2, %v665_v42  ;;  %v392_v45 = vadd.f32 1.0, %v665_v42 }
 0x376   :  { %v395_v44 = vadd.f32 2.0, %v394_v43  ;;  %v393_v46 = vmul.f32 0.1, %v392_v45 }
 0x378   :  { %666 = vrcp.f32 %v395_v44 }
 0x382   :  { %v667_v47 = vpop.eup %666 }
 0x383   :  { %v397_v48 = vmul.f32 %v667_v47, %v393_v46 }
 0x385   :  { %v399_v51 = vmul.f32 %v398_v49, %v397_v48 }
 0x387   :  { %v400_v52 = vadd.f32 %v399_v51, %v943_v50 }
 0x389   :  { %401 = vst [vmem:[#allocation11] sm:$0xff] %v400_v52 }
 0x38a   :  { %789 = shalt.err (!%p786_p2)
}
 0x38b   :  { %s790_s17 = scalar_lea.hbm %s988_s6, 128 }
 0x38c   :  { %p791_p3 = scmp.ne.s32.totalorder %s988_s6, %s790_s17  ;;  %p794_p4 = scmp.lt.u32.totalorder %s790_s17, %s988_s6 }
 0x38e   :  { %p796_p5 = pnand %p794_p4, %p791_p3 }
 0x390   :  { %799 = shalt.err (!%p796_p5)
}
 0x391   :  { %411 = dma.vmem_to_hbm [thread:$0]  %s409_s14, 128, %s988_s6, [#allocation4]  }
 0x392   :  { %806 = dma.done.wait [#allocation4], 128  }
 0x393   :  { %807 = vsyncadd [#allocation4], 4294967168 }
 0x394   :  { %415 = vsyncpa [#allocation3], 1 }
 0x395   :  { %416 = vsyncpa [#allocation6], 1 }
 0x396   :  { %417 = vsyncpa [#allocation9], 1 }
 0x397   :  { %418 = vsyncpa [#allocation4], 1 }

// kernel: tpu_custom_call.1
= control target key start
LH: loop header
LB: loop body
LE: loop exit
PB: predicated region body
PF: predicated region fallthrough
CT: control target
= control target key end

     0   :  { %11 = vsyncpa [#allocation3], 0  ;;  %s982_s0 = inlined_call_operand.hbm [shape: f32[8,128], index: 0, kind: input, shape index: {}]   ;;  %s983_s1 = inlined_call_operand.hbm [shape: f32[8,128], index: 1, kind: input, shape index: {}]   ;;  %s984_s2 = inlined_call_operand.hbm [shape: f32[128,128], index: 2, kind: input, shape index: {}]   ;;  %s985_s3 = inlined_call_operand.hbm [shape: f32[128,128], index: 3, kind: input, shape index: {}]   ;;  %s986_s4 = inlined_call_operand.hbm [shape: f32[128,128], index: 4, kind: input, shape index: {}]   ;;  %s987_s5 = inlined_call_operand.vmem [shape: f32[8,128], index: 5, kind: input, shape index: {}]   ;;  %s988_s6 = inlined_call_operand.hbm [shape: f32[8,128], index: 6, kind: output, shape index: {}]  }
   0x1   :  { %12 = vsyncpa [#allocation6], 0 }
   0x2   :  { %13 = vsyncpa [#allocation9], 0 }
   0x3   :  { %14 = vsyncpa [#allocation4], 0  ;;  %s808_s21 = smov [#allocation5]   ;;  %s668_s25 = scalar_lea.hbm %s983_s1, 128 }
   0x4   :  { %s31_s22 = sshll.u32 %s808_s21, 4  ;;  %p669_p0 = scmp.ne.s32.totalorder %s983_s1, %s668_s25  ;;  %s32_s22 = int_to_ptr.vmem [resolvable:$true] %s31_s22 }
   0x5   :  { %p672_p1 = scmp.lt.u32.totalorder %s668_s25, %s983_s1 }
   0x7   :  { %p674_p2 = pnand %p672_p1, %p669_p0 }
   0x9   :  { %677 = shalt.err (!%p674_p2)
}
   0xa   :  { %s678_s30 = scalar_lea.vmem %s32_s22, 128  ;;  %p683_p4 = scmp.lt.s32.totalorder %s32_s22, %s32_s22 }
   0xb   :  { %p679_p3 = scmp.ne.s32.totalorder %s32_s22, %s678_s30  ;;  %p684_p5 = scmp.lt.s32.totalorder %s678_s30, %s678_s30 }
   0xd   :  { %p685_p6 = por %p684_p5, %p683_p4 }
   0xf   :  { %p686_p7 = pnand %p685_p6, %p679_p3 }
  0x11   :  { %689 = shalt.err (!%p686_p7)
}
  0x12   :  { %34 = dma.hbm_to_vmem [thread:$0]  %s983_s1, 128, %s32_s22, [#allocation6]  }
  0x13   :  { %s809_s9 = smov [#allocation8]   ;;  %s810_s11 = smov [#allocation2]  }
  0x14   :  { %s52_s10 = sshll.u32 %s809_s9, 4  ;;  %s21_s12 = sshll.u32 %s810_s11, 4  ;;  %s53_s10 = int_to_ptr.vmem [resolvable:$true] %s52_s10  ;;  %s22_s12 = int_to_ptr.vmem [resolvable:$true] %s21_s12 }
  0x15   :  { %s690_s15 = scalar_lea.hbm %s985_s3, 2048 }
  0x16   :  { %p691_p8 = scmp.ne.s32.totalorder %s985_s3, %s690_s15  ;;  %p694_p9 = scmp.lt.u32.totalorder %s690_s15, %s985_s3 }
  0x18   :  { %p696_p10 = pnand %p694_p9, %p691_p8 }
  0x1a   :  { %699 = shalt.err (!%p696_p10)
}
  0x1b   :  { %s700_s1 = scalar_lea.vmem %s53_s10, 2048  ;;  %p705_p12 = scmp.lt.s32.totalorder %s53_s10, %s53_s10 }
  0x1c   :  { %p701_p11 = scmp.ne.s32.totalorder %s53_s10, %s700_s1  ;;  %p706_p13 = scmp.lt.s32.totalorder %s700_s1, %s700_s1 }
  0x1e   :  { %p707_p0 = por %p706_p13, %p705_p12 }
  0x20   :  { %p708_p1 = pnand %p707_p0, %p701_p11 }
  0x22   :  { %711 = shalt.err (!%p708_p1)
}
  0x23   :  { %s811_s20 = smov 128   ;;  %s812_s21 = smov 8  }
  0x24   :  { %58 = dma.hbm_to_vmem [thread:$0]  %s985_s3, 2048, %s53_s10, [#allocation9], %s811_s20, %s811_s20, %s812_s21  }
  0x25   :  { %s712_s26 = scalar_lea.hbm %s982_s0, 128 }
  0x26   :  { %p713_p2 = scmp.ne.s32.totalorder %s982_s0, %s712_s26  ;;  %p716_p3 = scmp.lt.u32.totalorder %s712_s26, %s982_s0 }
  0x28   :  { %p718_p4 = pnand %p716_p3, %p713_p2 }
  0x2a   :  { %721 = shalt.err (!%p718_p4)
}
  0x2b   :  { %s722_s7 = scalar_lea.vmem %s22_s12, 128  ;;  %p727_p6 = scmp.lt.s32.totalorder %s22_s12, %s22_s12 }
  0x2c   :  { %p723_p5 = scmp.ne.s32.totalorder %s22_s12, %s722_s7  ;;  %p728_p7 = scmp.lt.s32.totalorder %s722_s7, %s722_s7 }
  0x2e   :  { %p729_p8 = por %p728_p7, %p727_p6 }
  0x30   :  { %p730_p9 = pnand %p729_p8, %p723_p5 }
  0x32   :  { %733 = shalt.err (!%p730_p9)
}
  0x33   :  { %24 = dma.hbm_to_vmem [thread:$0]  %s982_s0, 128, %s22_s12, [#allocation3]  }
  0x34   :  { %s813_s9 = smov [#allocation7]   ;;  %s814_s11 = smov [#allocation10]  }
  0x35   :  { %s40_s10 = sshll.u32 %s813_s9, 4  ;;  %s64_s13 = sshll.u32 %s814_s11, 4  ;;  %s41_s10 = int_to_ptr.vmem [resolvable:$true] %s40_s10  ;;  %s65_s13 = int_to_ptr.vmem [resolvable:$true] %s64_s13 }
  0x36   :  { %s734_s16 = scalar_lea.hbm %s984_s2, 2048 }
  0x37   :  { %p735_p10 = scmp.ne.s32.totalorder %s984_s2, %s734_s16  ;;  %p738_p11 = scmp.lt.u32.totalorder %s734_s16, %s984_s2 }
  0x39   :  { %p740_p12 = pnand %p738_p11, %p735_p10 }
  0x3b   :  { %743 = shalt.err (!%p740_p12)
}
  0x3c   :  { %s744_s0 = scalar_lea.vmem %s41_s10, 2048  ;;  %p749_p0 = scmp.lt.s32.totalorder %s41_s10, %s41_s10 }
  0x3d   :  { %p745_p13 = scmp.ne.s32.totalorder %s41_s10, %s744_s0  ;;  %p750_p1 = scmp.lt.s32.totalorder %s744_s0, %s744_s0 }
  0x3f   :  { %p751_p2 = por %p750_p1, %p749_p0 }
  0x41   :  { %p752_p3 = pnand %p751_p2, %p745_p13 }
  0x43   :  { %755 = shalt.err (!%p752_p3)
}
  0x44   :  { %46 = dma.hbm_to_vmem [thread:$0]  %s984_s2, 2048, %s41_s10, [#allocation6], %s811_s20, %s811_s20, %s812_s21  }
  0x45   :  { %s756_s25 = scalar_lea.hbm %s986_s4, 2048 }
  0x46   :  { %p757_p4 = scmp.ne.s32.totalorder %s986_s4, %s756_s25  ;;  %p760_p5 = scmp.lt.u32.totalorder %s756_s25, %s986_s4 }
  0x48   :  { %p762_p6 = pnand %p760_p5, %p757_p4 }
  0x4a   :  { %765 = shalt.err (!%p762_p6)
}
  0x4b   :  { %s766_s30 = scalar_lea.vmem %s65_s13, 2048  ;;  %p771_p8 = scmp.lt.s32.totalorder %s65_s13, %s65_s13 }
  0x4c   :  { %p767_p7 = scmp.ne.s32.totalorder %s65_s13, %s766_s30  ;;  %p772_p9 = scmp.lt.s32.totalorder %s766_s30, %s766_s30 }
  0x4e   :  { %p773_p10 = por %p772_p9, %p771_p8 }
  0x50   :  { %p774_p11 = pnand %p773_p10, %p767_p7 }
  0x52   :  { %777 = shalt.err (!%p774_p11)
}
  0x53   :  { %70 = dma.hbm_to_vmem [thread:$0]  %s986_s4, 2048, %s65_s13, [#allocation9], %s811_s20, %s811_s20, %s812_s21  }
  0x54   :  { %800 = dma.done.wait [#allocation3], 128  }
  0x55   :  { %801 = vsyncadd [#allocation3], 4294967168 }
  0x56   :  { %802 = dma.done.wait [#allocation6], 2176  }
  0x57   :  { %803 = vsyncadd [#allocation6], 4294965120 }
  0x58   :  { %804 = dma.done.wait [#allocation9], 4096  }
  0x59   :  { %805 = vsyncadd [#allocation9], 4294963200  ;;  %v815_v0 = vmov 0.0|0.0   ;;  %vm816_vm0 = vmmov 0   ;;  %v817_v1 = vmov 0.0   ;;  %v106_v2 = vld [vmem:[#allocation8] sm:$0xff] }
  0x5a   :  { %579 = vmatprep.subr.bf16.mxu0 %v815_v0  ;;  %603 = vmatprep.subr.bf16.mxu1 %v815_v0  ;;  %v107_v3 = vld [vmem:[#allocation8 + $0x8] sm:$0xff]  ;;  %v90_v4 = vld [vmem:[#allocation7] sm:$0xff]  ;;  %v108_v7 = vld [vmem:[#allocation8 + $0x10] sm:$0xff]  ;;  %s818_s13 = smov [#allocation11]  }
  0x5b   :  { %506 = vmatprep.mubr.msk.f32.mxu0 %vm816_vm0, %v817_v1  ;;  %541 = vmatprep.mubr.msk.f32.mxu1 %vm816_vm0, %v817_v1  ;;  %v580_v5 = vpack.c.bf16 %v107_v3, %v106_v2  ;;  %v91_v6 = vld [vmem:[#allocation7 + $0x8] sm:$0xff]  ;;  %v109_v8 = vld [vmem:[#allocation8 + $0x18] sm:$0xff]  ;;  %v92_v10 = vld [vmem:[#allocation7 + $0x10] sm:$0xff]  ;;  %s408_s14 = sshll.u32 %s818_s13, 4  ;;  %s409_s14 = int_to_ptr.vmem [resolvable:$true] %s408_s14 }
  0x5c   :  { %v604_v9 = vpack.c.bf16 %v91_v6, %v90_v4  ;;  %v93_v11 = vld [vmem:[#allocation7 + $0x18] sm:$0xff]  ;;  %v583_v12 = vpack.c.bf16 %v109_v8, %v108_v7  ;;  %v110_v14 = vld [vmem:[#allocation8 + $0x20] sm:$0xff]  ;;  %v111_v15 = vld [vmem:[#allocation8 + $0x28] sm:$0xff]  ;;  %p783_p13 = scmp.lt.s32.totalorder %s409_s14, %s409_s14 }
  0x5d   :  { %581 = vmatpush3.bf16.msra.mxu0 %v580_v5  ;;  %v607_v13 = vpack.c.bf16 %v93_v11, %v92_v10  ;;  %v94_v16 = vld [vmem:[#allocation7 + $0x20] sm:$0xff]  ;;  %v95_v17 = vld [vmem:[#allocation7 + $0x28] sm:$0xff]  ;;  %v586_v18 = vpack.c.bf16 %v111_v15, %v110_v14  ;;  %v112_v20 = vld [vmem:[#allocation8 + $0x30] sm:$0xff]  ;;  %v272_v5 = vlaneseq }
  0x5e   :  { %605 = vmatpush3.bf16.msra.mxu1 %v604_v9  ;;  %582 = vmatprep.subr.bf16.mxu0 %v815_v0  ;;  %v610_v19 = vpack.c.bf16 %v95_v17, %v94_v16  ;;  %v113_v21 = vld [vmem:[#allocation8 + $0x38] sm:$0xff]  ;;  %v96_v22 = vld [vmem:[#allocation7 + $0x30] sm:$0xff]  ;;  %v114_v26 = vld [vmem:[#allocation8 + $0x40] sm:$0xff] }
  0x5f   :  { %606 = vmatprep.subr.bf16.mxu1 %v815_v0  ;;  %v97_v23 = vld [vmem:[#allocation7 + $0x38] sm:$0xff]  ;;  %v589_v24 = vpack.c.bf16 %v113_v21, %v112_v20  ;;  %v115_v27 = vld [vmem:[#allocation8 + $0x48] sm:$0xff]  ;;  %v98_v28 = vld [vmem:[#allocation7 + $0x40] sm:$0xff]  ;;  %v273_v6 = vand.u32 127, %v272_v5 }
  0x60   :  { %v613_v25 = vpack.c.bf16 %v97_v23, %v96_v22  ;;  %v99_v29 = vld [vmem:[#allocation7 + $0x48] sm:$0xff]  ;;  %v592_v30 = vpack.c.bf16 %v115_v27, %v114_v26  ;;  %v116_v32 = vld [vmem:[#allocation8 + $0x50] sm:$0xff]  ;;  %v117_v33 = vld [vmem:[#allocation8 + $0x58] sm:$0xff] }
  0x61   :  { %584 = vmatpush3.bf16.msra.mxu0 %v583_v12  ;;  %v616_v31 = vpack.c.bf16 %v99_v29, %v98_v28  ;;  %v100_v34 = vld [vmem:[#allocation7 + $0x50] sm:$0xff]  ;;  %v101_v35 = vld [vmem:[#allocation7 + $0x58] sm:$0xff]  ;;  %v595_v36 = vpack.c.bf16 %v117_v33, %v116_v32  ;;  %v118_v38 = vld [vmem:[#allocation8 + $0x60] sm:$0xff]  ;;  %vm274_vm1 = vcmp.lt.s32.totalorder %v273_v6, 32 }
  0x62   :  { %608 = vmatpush3.bf16.msra.mxu1 %v607_v13  ;;  %585 = vmatprep.subr.bf16.mxu0 %v815_v0  ;;  %v619_v37 = vpack.c.bf16 %v101_v35, %v100_v34  ;;  %v119_v39 = vld [vmem:[#allocation8 + $0x68] sm:$0xff]  ;;  %v102_v40 = vld [vmem:[#allocation7 + $0x60] sm:$0xff]  ;;  %v120_v44 = vld [vmem:[#allocation8 + $0x70] sm:$0xff] }
  0x63   :  { %609 = vmatprep.subr.bf16.mxu1 %v815_v0  ;;  %v103_v41 = vld [vmem:[#allocation7 + $0x68] sm:$0xff]  ;;  %v598_v42 = vpack.c.bf16 %v119_v39, %v118_v38  ;;  %v121_v45 = vld [vmem:[#allocation8 + $0x78] sm:$0xff]  ;;  %v104_v46 = vld [vmem:[#allocation7 + $0x70] sm:$0xff] }
  0x64   :  { %v622_v43 = vpack.c.bf16 %v103_v41, %v102_v40  ;;  %v105_v47 = vld [vmem:[#allocation7 + $0x78] sm:$0xff]  ;;  %v601_v48 = vpack.c.bf16 %v121_v45, %v120_v44  ;;  %v89_v51 = vld [vmem:[#allocation2] sm:$0xff]  ;;  %v297_v59 = vld [vmem:[#allocation10] sm:$0xff] }
  0x65   :  { %587 = vmatpush3.bf16.msra.mxu0 %v586_v18  ;;  %v625_v49 = vpack.c.bf16 %v105_v47, %v104_v46  ;;  %v943_v50 = vld [vmem:[#allocation5] sm:$0xff]  ;;  %v419_v55 = vld [vmem:[%s987_s5] ss:$0 sm:$0xff]  ;;  %v298_v60 = vld [vmem:[#allocation10 + $0x8] sm:$0xff] }
  0x66   :  { %611 = vmatpush3.bf16.msra.mxu1 %v610_v19  ;;  %588 = vmatprep.subr.bf16.mxu0 %v815_v0  ;;  %v299_v61 = vld [vmem:[#allocation10 + $0x10] sm:$0xff]  ;;  %v628_v62 = vpack.c.bf16 %v298_v60, %v297_v59  ;;  %v300_v63 = vld [vmem:[#allocation10 + $0x18] sm:$0xff]  ;;  %v302_v3 = vld [vmem:[#allocation10 + $0x28] sm:$0xff] }
  0x67   :  { %612 = vmatprep.subr.bf16.mxu1 %v815_v0  ;;  %v631_v2 = vpack.c.bf16 %v300_v63, %v299_v61  ;;  %v303_v12 = vld [vmem:[#allocation10 + $0x30] sm:$0xff]  ;;  %v304_v13 = vld [vmem:[#allocation10 + $0x38] sm:$0xff]  ;;  %v305_v15 = vld [vmem:[#allocation10 + $0x40] sm:$0xff] }
  0x68   :  { %v637_v14 = vpack.c.bf16 %v304_v13, %v303_v12  ;;  %v306_v16 = vld [vmem:[#allocation10 + $0x48] sm:$0xff]  ;;  %v307_v18 = vld [vmem:[#allocation10 + $0x50] sm:$0xff]  ;;  %v308_v19 = vld [vmem:[#allocation10 + $0x58] sm:$0xff] }
  0x69   :  { %590 = vmatpush3.bf16.msra.mxu0 %v589_v24  ;;  %v640_v17 = vpack.c.bf16 %v306_v16, %v305_v15  ;;  %v643_v20 = vpack.c.bf16 %v308_v19, %v307_v18  ;;  %v309_v21 = vld [vmem:[#allocation10 + $0x60] sm:$0xff]  ;;  %v310_v22 = vld [vmem:[#allocation10 + $0x68] sm:$0xff]  ;;  %v311_v24 = vld [vmem:[#allocation10 + $0x70] sm:$0xff] }
  0x6a   :  { %614 = vmatpush3.bf16.msra.mxu1 %v613_v25  ;;  %591 = vmatprep.subr.bf16.mxu0 %v815_v0  ;;  %v646_v23 = vpack.c.bf16 %v310_v22, %v309_v21  ;;  %v312_v25 = vld [vmem:[#allocation10 + $0x78] sm:$0xff]  ;;  %v421_v33 = vld [vmem:[%s987_s5 + $0x2] ss:$0 sm:$0xff] }
  0x6b   :  { %615 = vmatprep.subr.bf16.mxu1 %v815_v0  ;;  %v649_v26 = vpack.c.bf16 %v312_v25, %v311_v24 }
  0x6d   :  { %593 = vmatpush3.bf16.msra.mxu0 %v592_v30  ;;  %v420_v30 = vld [vmem:[%s987_s5 + $0x1] ss:$0 sm:$0xff] }
  0x6e   :  { %617 = vmatpush3.bf16.msra.mxu1 %v616_v31  ;;  %594 = vmatprep.subr.bf16.mxu0 %v815_v0 }
  0x6f   :  { %618 = vmatprep.subr.bf16.mxu1 %v815_v0 }
  0x71   :  { %596 = vmatpush3.bf16.msra.mxu0 %v595_v36 }
  0x72   :  { %620 = vmatpush3.bf16.msra.mxu1 %v619_v37  ;;  %597 = vmatprep.subr.bf16.mxu0 %v815_v0 }
  0x73   :  { %621 = vmatprep.subr.bf16.mxu1 %v815_v0 }
  0x75   :  { %599 = vmatpush3.bf16.msra.mxu0 %v598_v42 }
  0x76   :  { %623 = vmatpush3.bf16.msra.mxu1 %v622_v43  ;;  %600 = vmatprep.subr.bf16.mxu0 %v815_v0 }
  0x77   :  { %624 = vmatprep.subr.bf16.mxu1 %v815_v0 }
  0x79   :  { %602 = vmatpush3.bf16.msra.mxu0 %v601_v48 }
  0x7a   :  { %626 = vmatpush3.bf16.msra.mxu1 %v625_v49  ;;  %627 = vmatprep.subr.bf16.mxu0 %v815_v0 }
  0x7c   :  { %507 = vmatmul.mubr.f32.vlgmr.msra.gmra.mrb[0].mxu0 %v943_v50 }
  0x7d   :  { %542 = vmatmul.mubr.f32.vlgmr.msra.gmra.mrb[0].mxu1 %v89_v51  ;;  %576 = vmatprep.mubr.msk.f32.mxu0 %vm816_vm0, %v817_v1  ;;  %v301_v1 = vld [vmem:[#allocation10 + $0x20] sm:$0xff] }
  0x7e   :  { %629 = vmatpush3.bf16.msra.mxu0 %v628_v62  ;;  %v634_v4 = vpack.c.bf16 %v302_v3, %v301_v1 }
  0x7f   :  { %630 = vmatprep.subr.bf16.mxu0 %v815_v0 }
  0x82   :  { %632 = vmatpush3.bf16.msra.mxu0 %v631_v2 }
  0x83   :  { %633 = vmatprep.subr.bf16.mxu0 %v815_v0 }
  0x86   :  { %635 = vmatpush3.bf16.msra.mxu0 %v634_v4 }
  0x87   :  { %636 = vmatprep.subr.bf16.mxu0 %v815_v0 }
  0x8a   :  { %638 = vmatpush3.bf16.msra.mxu0 %v637_v14 }
  0x8b   :  { %639 = vmatprep.subr.bf16.mxu0 %v815_v0 }
  0x8e   :  { %641 = vmatpush3.bf16.msra.mxu0 %v640_v17 }
  0x8f   :  { %642 = vmatprep.subr.bf16.mxu0 %v815_v0 }
  0x92   :  { %644 = vmatpush3.bf16.msra.mxu0 %v643_v20 }
  0x93   :  { %645 = vmatprep.subr.bf16.mxu0 %v815_v0 }
  0x96   :  { %647 = vmatpush3.bf16.msra.mxu0 %v646_v23 }
  0x97   :  { %648 = vmatprep.subr.bf16.mxu0 %v815_v0  ;;  %v422_v0 = vld [vmem:[%s987_s5 + $0x3] ss:$0 sm:$0xff]  ;;  %s778_s5 = scalar_lea.vmem %s409_s14, 128 }
  0x98   :  { %p779_p12 = scmp.ne.s32.totalorder %s409_s14, %s778_s5  ;;  %p784_p0 = scmp.lt.s32.totalorder %s778_s5, %s778_s5 }
  0x9a   :  { %650 = vmatpush3.bf16.msra.mxu0 %v649_v26  ;;  %p785_p1 = por %p784_p0, %p783_p13 }
  0x9c   :  { %p786_p2 = pnand %p785_p1, %p779_p12 }
 0x14f   :  { %v188_v52 = vpop.f32.mrb[0].mxu0 }
 0x150   :  { %v258_v53 = vpop.f32.mrb[0].mxu1  ;;  %v508_v54 = vpop.f32.mrb[1].mxu0 }
 0x151   :  { %v259_v56 = vadd.f32 %v258_v53, %v188_v52  ;;  %v543_v57 = vpop.f32.mrb[1].mxu1 }
 0x153   :  { %v267_v58 = vadd.f32 %v419_v55, %v259_v56 }
 0x155   :  { %268 = vadd.xlane.f32.xlu0 %v267_v58 }
 0x1e2   :  { %v269_v7 = vpop.xlane.xlu0 %268 }
 0x1e3   :  { %v270_v8 = vmul.f32 0.03125, %v269_v7 }
 0x1e5   :  { %v271_v9 = vsub.f32 %v267_v58, %v270_v8 }
 0x1e7   :  { %v277_v10 = vsel %vm274_vm1, %v271_v9, 0.0 }
 0x1e8   :  { %v278_v11 = vmul.f32 %v277_v10, %v277_v10 }
 0x1ea   :  { %279 = vadd.xlane.f32.xlu0 %v278_v11 }
 0x277   :  { %v280_v27 = vpop.xlane.xlu0 %279 }
 0x278   :  { %v281_v28 = vmul.f32 0.03125, %v280_v27 }
 0x27a   :  { %v282_v29 = vadd.f32 1e-05, %v281_v28 }
 0x27c   :  { %662 = vrsqrt.f32 %v282_v29 }
 0x286   :  { %v663_v31 = vpop.eup %662 }
 0x287   :  { %v289_v32 = vmul.f32 %v663_v31, %v420_v30 }
 0x289   :  { %v290_v34 = vmul.f32 %v289_v32, %v277_v10 }
 0x28b   :  { %v296_v35 = vadd.f32 %v421_v33, %v290_v34 }
 0x28d   :  { %577 = vmatmul.mubr.f32.vlgmr.msra.gmra.mrb[2].mxu0 %v296_v35  ;;  %v398_v49 = vsub.f32 %v296_v35, %v943_v50 }
 0x360   :  { %v384_v36 = vpop.f32.mrb[2].mxu0 }
 0x361   :  { %v385_v37 = vadd.f32 %v422_v0, %v384_v36  ;;  %v578_v38 = vpop.f32.mrb[3].mxu0 }
 0x363   :  { %v388_v39 = vsub.f32 0.0, %v385_v37 }
 0x365   :  { %v389_v40 = vmin.f32 %v388_v39, 60.0 }
 0x367   :  { %v390_v41 = vmul.f32 1.442695, %v389_v40 }
 0x369   :  { %664 = vpow2.f32 %v390_v41 }
 0x373   :  { %v665_v42 = vpop.eup %664 }
 0x374   :  { %v394_v43 = vmul.f32 0.2, %v665_v42  ;;  %v392_v45 = vadd.f32 1.0, %v665_v42 }
 0x376   :  { %v395_v44 = vadd.f32 2.0, %v394_v43  ;;  %v393_v46 = vmul.f32 0.1, %v392_v45 }
 0x378   :  { %666 = vrcp.f32 %v395_v44 }
 0x382   :  { %v667_v47 = vpop.eup %666 }
 0x383   :  { %v397_v48 = vmul.f32 %v667_v47, %v393_v46 }
 0x385   :  { %v399_v51 = vmul.f32 %v398_v49, %v397_v48 }
 0x387   :  { %v400_v52 = vadd.f32 %v399_v51, %v943_v50 }
 0x389   :  { %401 = vst [vmem:[#allocation11] sm:$0xff] %v400_v52 }
 0x38a   :  { %789 = shalt.err (!%p786_p2)
}
 0x38b   :  { %s790_s17 = scalar_lea.hbm %s988_s6, 128 }
 0x38c   :  { %p791_p3 = scmp.ne.s32.totalorder %s988_s6, %s790_s17  ;;  %p794_p4 = scmp.lt.u32.totalorder %s790_s17, %s988_s6 }
 0x38e   :  { %p796_p5 = pnand %p794_p4, %p791_p3 }
 0x390   :  { %799 = shalt.err (!%p796_p5)
}
 0x391   :  { %411 = dma.vmem_to_hbm [thread:$0]  %s409_s14, 128, %s988_s6, [#allocation4]  }
 0x392   :  { %806 = dma.done.wait [#allocation4], 128  }
 0x393   :  { %807 = vsyncadd [#allocation4], 4294967168 }
 0x394   :  { %415 = vsyncpa [#allocation3], 1 }
 0x395   :  { %416 = vsyncpa [#allocation6], 1 }
 0x396   :  { %417 = vsyncpa [#allocation9], 1 }
 0x397   :  { %418 = vsyncpa [#allocation4], 1 }

</bundles_post_ra>
